<compile_context>
chip_gen: v6e
topology: v6e:2x2x1
jax: 0.10.0
libtpu: 0.0.40
codegen_flags: <defaults>
</compile_context>

<pallas_src>
import functools

import jax
import jax.numpy as jnp
from jax import lax
from jax.experimental import pallas as pl
from jax.experimental.pallas import tpu as pltpu


# ----------------------------------------------------------------------------
# Fused GCNBlock kernel
# ----------------------------------------------------------------------------
def _gcn_block_kernel(*refs, n_layer, has_proj, sc_mode, compute_dtype):
    # refs: x, adj, (W_i, b_i) * n_layer, [W_proj], [W_ci, b_ci, W_co, b_co], out
    x_ref, adj_ref = refs[0], refs[1]
    idx = 2
    layer_refs = []
    for _ in range(n_layer):
        layer_refs.append((refs[idx], refs[idx + 1]))
        idx += 2
    w_proj_ref = None
    if has_proj:
        w_proj_ref = refs[idx]
        idx += 1
    if sc_mode == "gsc":
        w_ci_ref, b_ci_ref, w_co_ref, b_co_ref = refs[idx:idx + 4]
        idx += 4
    out_ref = refs[idx]
    assert idx == len(refs) - 1

    tb, n_atom, in_dim = x_ref.shape
    dn = (((1,), (1,)), ((), ()))     # contract on d_in of the (d_out, d_in) layout

    x = x_ref[...]                    # (TB, n_atom, in_dim)   compute_dtype
    adj = adj_ref[...]                # (TB, n_atom, n_atom)   compute_dtype

    def linear2d(v2d, w_ref, b_ref=None):
        out = lax.dot_general(v2d.astype(compute_dtype), w_ref[...], dn,
                              preferred_element_type=jnp.float32)
        if b_ref is not None:
            out = out + b_ref[...]    # f32 bias epilogue
        return out

    h = x
    for i in range(n_layer):
        w_ref, b_ref = layer_refs[i]
        d_out, d_in = w_ref.shape
        if d_in < d_out:
            # (adj @ h) @ W.T + rowsum(adj) * b   (fewer MXU flops in this order)
            ah = jnp.einsum("bij,bjk->bik", adj, h.astype(compute_dtype),
                            preferred_element_type=jnp.float32)
            agg = linear2d(ah.reshape(tb * n_atom, d_in), w_ref)
            agg = agg.reshape(tb, n_atom, d_out)
            row_sum = jnp.sum(adj.astype(jnp.float32), axis=-1, keepdims=True)
            agg = agg + row_sum * b_ref[...].reshape(1, 1, d_out)
        else:
            # adj @ (h @ W.T + b) -- one big MXU matmul over TB*n_atom rows
            lin = linear2d(h.reshape(tb * n_atom, d_in), w_ref, b_ref)
            lin = lin.reshape(tb, n_atom, d_out).astype(compute_dtype)
            agg = jnp.einsum("bij,bjk->bik", adj, lin,
                             preferred_element_type=jnp.float32)
        if i != n_layer - 1:
            agg = jnp.maximum(agg, 0.0)      # GCNBlock inner-layer ReLU
        h = agg                              # f32

    out_dim = h.shape[-1]
    h2d = h.reshape(tb * n_atom, out_dim)

    # residual path of the skip connection
    if has_proj:
        res2d = linear2d(x.reshape(tb * n_atom, in_dim), w_proj_ref)
    else:
        res2d = x.reshape(tb * n_atom, in_dim).astype(jnp.float32)

    if sc_mode == "gsc":
        z = jax.nn.sigmoid(linear2d(res2d, w_ci_ref, b_ci_ref)
                           + linear2d(h2d, w_co_ref, b_co_ref))
        out = z * h2d + (1.0 - z) * res2d
    elif sc_mode == "sc":
        out = res2d + h2d
    else:
        out = h2d

    out = jnp.maximum(out, 0.0)              # GCNBlock final ReLU
    out_ref[...] = out.reshape(tb, n_atom, out_dim).astype(out_ref.dtype)


# ----------------------------------------------------------------------------
# Fused ReadOut + Predictor-head kernel
# ----------------------------------------------------------------------------
def _head_kernel(x_ref, w_ro, b_ro, w1, b1, w2, b2, w3, b3, out_ref,
                 *, n_atom, compute_dtype):
    dn = (((1,), (1,)), ((), ()))
    x = x_ref[...]                                    # (B, n_atom, hidden)
    # sum_atoms(x @ W.T + b) == sum_atoms(x) @ W.T + n_atom * b
    pooled = jnp.sum(x.astype(jnp.float32), axis=1)   # (B, hidden)

    def lin(v, w_ref, b_ref, scale_b=1.0):
        o = lax.dot_general(v.astype(compute_dtype), w_ref[...], dn,
                            preferred_element_type=jnp.float32)
        return o + scale_b * b_ref[...]

    h = jnp.maximum(lin(pooled, w_ro, b_ro, float(n_atom)), 0.0)   # ReadOut + ReLU
    h = jnp.maximum(lin(h, w1, b1), 0.0)                           # pred1 + ReLU
    h = jnp.tanh(lin(h, w2, b2))                                   # pred2 + Tanh
    h = lin(h, w3, b3)                                             # pred3
    out_ref[...] = h.astype(out_ref.dtype)


# ----------------------------------------------------------------------------
# Tiling / VMEM helpers
# ----------------------------------------------------------------------------
def _round_up(n, m):
    return ((n + m - 1) // m) * m


def _tile_bytes(rows, cols, itemsize):
    return _round_up(rows, 8) * _round_up(cols, 128) * itemsize


def _pick_batch_block(batch, n_atom, in_dim, out_dim, itemsize,
                      vmem_budget=24 * 1024 * 1024, max_block=128):
    """Largest divisor of `batch` that fits a VMEM budget and keeps grid >= 2."""
    per_graph = itemsize * n_atom * (in_dim + n_atom + out_dim) + 4 * n_atom * out_dim
    cap = max(1, min(batch, max_block, vmem_budget // max(1, 8 * per_graph)))
    if batch >= 2:
        cap = min(cap, max(1, batch // 2))   # keep grid >= 2 (v7x: 2 TensorCores)
    best = 1
    for d in range(1, cap + 1):
        if batch % d == 0:
            best = d
    return best


def _vmem_limit_bytes(tb, n_atom, in_dim, out_dim, itemsize, operands):
    """Double-buffered tiles + resident params + f32 scratch, clamped to
    [16 MiB, 48 MiB] -- safe on v5e/v6e (128 MiB) and v7x (64 MiB)."""
    x_t = tb * _tile_bytes(n_atom, in_dim, itemsize)
    a_t = tb * _tile_bytes(n_atom, n_atom, itemsize)
    o_t = tb * _tile_bytes(n_atom, out_dim, 4)
    params = sum(_tile_bytes(op.shape[-2], op.shape[-1],
                             jnp.dtype(op.dtype).itemsize)
                 for op in operands[2:])
    scratch = 6 * tb * _tile_bytes(n_atom, max(in_dim, out_dim, n_atom), 4)
    need = 2 * (x_t + a_t + o_t) + params + scratch
    return int(min(48 * 1024 * 1024, max(16 * 1024 * 1024, 2 * need)))


# ----------------------------------------------------------------------------
# Wrappers
# ----------------------------------------------------------------------------
def gcn_block_forward(x, adj, layers, sc_params, *, sc="gsc",
                      batch_block=None, compute_dtype=jnp.float32):
    """One fused GCNBlock forward.

    x: (B, n_atom, in_dim), adj: (B, n_atom, n_atom)
    layers: list of (W (d_out, d_in), b (d_out,))  -- PyTorch nn.Linear layout
    sc_params: optional 'w_proj' and (for 'gsc') 'w_ci','b_ci','w_co','b_co'
    Returns (out, adj) like the PyTorch module.
    """
    B, n_atom, in_dim = x.shape
    assert adj.shape == (B, n_atom, n_atom)
    out_dim = layers[-1][0].shape[0]
    compute_dtype = jnp.dtype(compute_dtype)
    itemsize = compute_dtype.itemsize

    tb = batch_block if batch_block is not None else _pick_batch_block(
        B, n_atom, in_dim, out_dim, itemsize)
    assert B % tb == 0, "batch_block must divide the batch size"
    grid_b = B // tb

    has_proj = (sc in ("gsc", "sc")) and ("w_proj" in sc_params)

    operands = [x.astype(compute_dtype), adj.astype(compute_dtype)]
    in_specs = [
        pl.BlockSpec((tb, n_atom, in_dim), lambda b: (b, 0, 0)),
        pl.BlockSpec((tb, n_atom, n_atom), lambda b: (b, 0, 0)),
    ]

    def add_param(arr, as_f32=False):
        arr = arr.astype(jnp.float32 if as_f32 else compute_dtype)
        operands.append(arr)
        # Constant index map -> parameter stays VMEM-resident (no re-DMA).
        in_specs.append(pl.BlockSpec(arr.shape, lambda b, nd=arr.ndim: (0,) * nd))

    for (w, bvec) in layers:
        add_param(w)                           # (d_out, d_in), PyTorch layout
        add_param(bvec.reshape(1, -1), as_f32=True)
    if has_proj:
        add_param(sc_params["w_proj"])
    if sc == "gsc":
        add_param(sc_params["w_ci"])
        add_param(sc_params["b_ci"].reshape(1, -1), as_f32=True)
        add_param(sc_params["w_co"])
        add_param(sc_params["b_co"].reshape(1, -1), as_f32=True)

    kernel = functools.partial(
        _gcn_block_kernel, n_layer=len(layers), has_proj=has_proj,
        sc_mode=sc, compute_dtype=compute_dtype)

    out = pl.pallas_call(
        kernel,
        out_shape=jax.ShapeDtypeStruct((B, n_atom, out_dim), x.dtype),
        grid_spec=pl.GridSpec(
            grid=(grid_b,),
            in_specs=in_specs,
            out_specs=pl.BlockSpec((tb, n_atom, out_dim), lambda b: (b, 0, 0)),
        ),
        compiler_params=pltpu.CompilerParams(
            dimension_semantics=("parallel",),
            vmem_limit_bytes=_vmem_limit_bytes(tb, n_atom, in_dim, out_dim,
                                               itemsize, operands),
        ),
    )(*operands)
    return out, adj


def gcn_head_forward(x, head_params, *, compute_dtype=jnp.float32):
    """ReadOut (+ReLU) -> pred1 (+ReLU) -> pred2 (+Tanh) -> pred3, fused."""
    B, n_atom, hidden = x.shape
    compute_dtype = jnp.dtype(compute_dtype)
    (w_ro, b_ro), (w1, b1), (w2, b2), (w3, b3) = head_params
    out_dim = w3.shape[0]

    def pw(w):
        return w.astype(compute_dtype)

    def pb(b):
        return b.reshape(1, -1).astype(jnp.float32)

    operands = [x.astype(compute_dtype),
                pw(w_ro), pb(b_ro), pw(w1), pb(b1),
                pw(w2), pb(b2), pw(w3), pb(b3)]
    in_specs = [pl.BlockSpec(op.shape, lambda b, nd=op.ndim: (0,) * nd)
                for op in operands]

    kernel = functools.partial(_head_kernel, n_atom=n_atom,
                               compute_dtype=compute_dtype)
    # Head is tiny (a few small GEMMs on (B, hidden)); one grid step, fully
    # VMEM-resident.
    return pl.pallas_call(
        kernel,
        out_shape=jax.ShapeDtypeStruct((B, out_dim), x.dtype),
        grid_spec=pl.GridSpec(
            grid=(1,),
            in_specs=in_specs,
            out_specs=pl.BlockSpec((B, out_dim), lambda b: (0, 0)),
        ),
        compiler_params=pltpu.CompilerParams(
            dimension_semantics=("arbitrary",)),
    )(*operands)


def gcn_net_forward(x, adj, params, *, compute_dtype=jnp.float32,
                    batch_block=None):
    """Full GCNNet forward through the fused Pallas kernels."""
    out = x
    for blk in params["blocks"]:
        out, adj = gcn_block_forward(out, adj, blk["layers"], blk["sc"],
                                     sc=params["sc_type"],
                                     batch_block=batch_block,
                                     compute_dtype=compute_dtype)
    return gcn_head_forward(out, params["head"], compute_dtype=compute_dtype)


# ----------------------------------------------------------------------------
# Parameter init (mimics the PyTorch module's layouts) and pure-JAX reference
# ----------------------------------------------------------------------------
def _xavier_uniform(key, out_dim, in_dim, dtype=jnp.float32):
    limit = (6.0 / (in_dim + out_dim)) ** 0.5
    return jax.random.uniform(key, (out_dim, in_dim), dtype, -limit, limit)


def _linear_bias(key, out_dim, in_dim, dtype=jnp.float32):
    bound = 1.0 / (in_dim ** 0.5)
    return jax.random.uniform(key, (out_dim,), dtype, -bound, bound)


def init_gcn_net_params(key, *, n_block, n_layer, in_dim, hidden_dim,
                        pred_dim1, pred_dim2, pred_dim3, out_dim, sc="gsc"):
    blocks = []
    for b in range(n_block):
        blk_in = in_dim if b == 0 else hidden_dim
        layers = []
        for i in range(n_layer):
            d_in = blk_in if i == 0 else hidden_dim
            d_out = hidden_dim          # GCNNet uses out_dim == hidden_dim per block
            key, kw, kb = jax.random.split(key, 3)
            layers.append((_xavier_uniform(kw, d_out, d_in),
                           _linear_bias(kb, d_out, d_in)))
        sc_p = {}
        if sc in ("gsc", "sc") and blk_in != hidden_dim:
            key, kp = jax.random.split(key)
            sc_p["w_proj"] = _xavier_uniform(kp, hidden_dim, blk_in)
        if sc == "gsc":
            key, k1, k2, k3, k4 = jax.random.split(key, 5)
            sc_p["w_ci"] = _xavier_uniform(k1, hidden_dim, hidden_dim)
            sc_p["b_ci"] = _linear_bias(k2, hidden_dim, hidden_dim)
            sc_p["w_co"] = _xavier_uniform(k3, hidden_dim, hidden_dim)
            sc_p["b_co"] = _linear_bias(k4, hidden_dim, hidden_dim)
        blocks.append({"layers": layers, "sc": sc_p})

    head = []
    for d_in, d_out in [(hidden_dim, pred_dim1), (pred_dim1, pred_dim2),
                        (pred_dim2, pred_dim3), (pred_dim3, out_dim)]:
        key, kw, kb = jax.random.split(key, 3)
        head.append((_xavier_uniform(kw, d_out, d_in),
                     _linear_bias(kb, d_out, d_in)))
    return {"blocks": blocks, "head": head, "sc_type": sc}


def gcn_net_reference(x, adj, params):
    """Pure-jnp reference with PyTorch-order ops (linear -> adj matmul)."""
    sc = params["sc_type"]
    out = x
    for blk in params["blocks"]:
        residual = out
        h = out
        n_l = len(blk["layers"])
        for i, (w, b) in enumerate(blk["layers"]):
            h = jnp.einsum("bij,bjk->bik", adj, h @ w.T + b)
            if i != n_l - 1:
                h = jnp.maximum(h, 0.0)
        if sc in ("gsc", "sc"):
            if "w_proj" in blk["sc"]:
                residual = residual @ blk["sc"]["w_proj"].T
            if sc == "gsc":
                z = jax.nn.sigmoid(residual @ blk["sc"]["w_ci"].T + blk["sc"]["b_ci"]
                                   + h @ blk["sc"]["w_co"].T + blk["sc"]["b_co"])
                h = z * h + (1.0 - z) * residual
            else:
                h = residual + h
        out = jnp.maximum(h, 0.0)
    (w_ro, b_ro), (w1, b1), (w2, b2), (w3, b3) = params["head"]
    r = jnp.maximum(jnp.sum(out @ w_ro.T + b_ro, axis=1), 0.0)
    r = jnp.maximum(r @ w1.T + b1, 0.0)
    r = jnp.tanh(r @ w2.T + b2)
    return r @ w3.T + b3


if __name__ == "__main__":
    key = jax.random.PRNGKey(0)
    kx, ka, kp = jax.random.split(key, 3)

    B, n_atom = 8, 16
    in_dim, hidden_dim = 16, 32
    n_block, n_layer = 2, 2
    pred_dim1, pred_dim2, pred_dim3, out_dim = 32, 16, 8, 1

    x = jax.random.normal(kx, (B, n_atom, in_dim), jnp.float32)
    adj = jax.random.uniform(ka, (B, n_atom, n_atom), jnp.float32)

    params = init_gcn_net_params(
        kp, n_block=n_block, n_layer=n_layer, in_dim=in_dim,
        hidden_dim=hidden_dim, pred_dim1=pred_dim1, pred_dim2=pred_dim2,
        pred_dim3=pred_dim3, out_dim=out_dim, sc="gsc")

    # --- full GCNNet forward (f32), gated skip connection with projection ---
    pred = gcn_net_forward(x, adj, params, batch_block=4)
    pred = jax.block_until_ready(pred)
    ref = gcn_net_reference(x, adj, params)
    assert pred.shape == (B, out_dim)
    assert jnp.allclose(pred, ref, atol=2e-3, rtol=2e-3), "GCNNet f32 mismatch"

    # --- single block, in_dim == hidden (no projection), plain 'sc' skip ---
    params_sc = init_gcn_net_params(
        kp, n_block=1, n_layer=2, in_dim=hidden_dim, hidden_dim=hidden_dim,
        pred_dim1=pred_dim1, pred_dim2=pred_dim2, pred_dim3=pred_dim3,
        out_dim=out_dim, sc="sc")
    x2 = jax.random.normal(jax.random.fold_in(kx, 1), (B, n_atom, hidden_dim),
                           jnp.float32)
    blk = params_sc["blocks"][0]
    out_blk, adj_out = gcn_block_forward(x2, adj, blk["layers"], blk["sc"],
                                         sc="sc")
    out_blk = jax.block_until_ready(out_blk)
    h_ref = x2
    for i, (w, b) in enumerate(blk["layers"]):
        h_ref = jnp.einsum("bij,bjk->bik", adj, h_ref @ w.T + b)
        if i != len(blk["layers"]) - 1:
            h_ref = jnp.maximum(h_ref, 0.0)
    ref_blk = jnp.maximum(x2 + h_ref, 0.0)
    assert jnp.allclose(out_blk, ref_blk, atol=2e-3, rtol=2e-3), "block mismatch"
    assert adj_out is adj

    # --- bf16-input / f32-accumulate smoke run (v6e / v7x MXU path) ---
    pred_bf = gcn_net_forward(x, adj, params, compute_dtype=jnp.bfloat16)
    pred_bf = jax.block_until_ready(pred_bf)
    assert pred_bf.shape == (B, out_dim)
    assert bool(jnp.all(jnp.isfinite(pred_bf)))

    print("KERNEL_OK")
</pallas_src>

<mosaic_0001>
module attributes {stable_mosaic.version = 11 : i64} {
  func.func @_gcn_block_kernel(%arg0: i32, %arg1: memref<4x16x16xf32, #tpu.memory_space<vmem>>, %arg2: memref<4x16x16xf32, #tpu.memory_space<vmem>>, %arg3: memref<32x16xf32, #tpu.memory_space<vmem>>, %arg4: memref<1x32xf32, #tpu.memory_space<vmem>>, %arg5: memref<32x32xf32, #tpu.memory_space<vmem>>, %arg6: memref<1x32xf32, #tpu.memory_space<vmem>>, %arg7: memref<32x16xf32, #tpu.memory_space<vmem>>, %arg8: memref<32x32xf32, #tpu.memory_space<vmem>>, %arg9: memref<1x32xf32, #tpu.memory_space<vmem>>, %arg10: memref<32x32xf32, #tpu.memory_space<vmem>>, %arg11: memref<1x32xf32, #tpu.memory_space<vmem>>, %arg12: memref<4x16x32xf32, #tpu.memory_space<vmem>>) attributes {dimension_semantics = [#tpu.dimension_semantics<parallel>], iteration_bounds = array<i64: 2>, scalar_prefetch = 0 : i64, scratch_operands = 0 : i64, tpu.core_type = #tpu.core_type<tc>, window_params = [{transform_indices = @transform_0, window_bounds = array<i64: 4, 16, 16>}, {transform_indices = @transform_1, window_bounds = array<i64: 4, 16, 16>}, {pipeline_mode = #tpu.pipeline_mode<synchronous>, transform_indices = @transform_2, window_bounds = array<i64: 32, 16>}, {pipeline_mode = #tpu.pipeline_mode<synchronous>, transform_indices = @transform_3, window_bounds = array<i64: 1, 32>}, {pipeline_mode = #tpu.pipeline_mode<synchronous>, transform_indices = @transform_4, window_bounds = array<i64: 32, 32>}, {pipeline_mode = #tpu.pipeline_mode<synchronous>, transform_indices = @transform_5, window_bounds = array<i64: 1, 32>}, {pipeline_mode = #tpu.pipeline_mode<synchronous>, transform_indices = @transform_6, window_bounds = array<i64: 32, 16>}, {pipeline_mode = #tpu.pipeline_mode<synchronous>, transform_indices = @transform_7, window_bounds = array<i64: 32, 32>}, {pipeline_mode = #tpu.pipeline_mode<synchronous>, transform_indices = @transform_8, window_bounds = array<i64: 1, 32>}, {pipeline_mode = #tpu.pipeline_mode<synchronous>, transform_indices = @transform_9, window_bounds = array<i64: 32, 32>}, {pipeline_mode = #tpu.pipeline_mode<synchronous>, transform_indices = @transform_10, window_bounds = array<i64: 1, 32>}, {transform_indices = @transform_11, window_bounds = array<i64: 4, 16, 32>}]} {
    %c0 = arith.constant 0 : index
    %c0_0 = arith.constant 0 : index
    %c0_1 = arith.constant 0 : index
    %0 = vector.load %arg1[%c0, %c0_0, %c0_1] : memref<4x16x16xf32, #tpu.memory_space<vmem>>, vector<4x16x16xf32>
    %c0_2 = arith.constant 0 : index
    %c0_3 = arith.constant 0 : index
    %c0_4 = arith.constant 0 : index
    %1 = vector.load %arg2[%c0_2, %c0_3, %c0_4] : memref<4x16x16xf32, #tpu.memory_space<vmem>>, vector<4x16x16xf32>
    "tpu.trace_start"() <{level = 10 : i32, message = "bij,bjk->bik"}> : () -> ()
    %cst = arith.constant dense<0.000000e+00> : vector<4x16x16xf32>
    %2 = tpu.matmul %1, %0, %cst {dimension_numbers = #tpu.dot_dimension_numbers<[2], [1], [1], [2], [0, 0, 0, 1, 1, 2], [0], [0]>} : vector<4x16x16xf32>, vector<4x16x16xf32>, vector<4x16x16xf32> -> vector<4x16x16xf32>
    "tpu.trace_stop"() : () -> ()
    %3 = vector.shape_cast %2 : vector<4x16x16xf32> to vector<64x16xf32>
    %c0_5 = arith.constant 0 : index
    %c0_6 = arith.constant 0 : index
    %4 = vector.load %arg3[%c0_5, %c0_6] : memref<32x16xf32, #tpu.memory_space<vmem>>, vector<32x16xf32>
    %cst_7 = arith.constant dense<0.000000e+00> : vector<64x32xf32>
    %5 = tpu.matmul %3, %4, %cst_7 {dimension_numbers = #tpu.dot_dimension_numbers<[1], [1], [0], [0], [0, 0, 1, 0], [], []>} : vector<64x16xf32>, vector<32x16xf32>, vector<64x32xf32> -> vector<64x32xf32>
    %6 = vector.shape_cast %5 : vector<64x32xf32> to vector<4x16x32xf32>
    %cst_8 = arith.constant dense<0.000000e+00> : vector<4x16xf32>
    %7 = vector.multi_reduction <add>, %1, %cst_8 [2] : vector<4x16x16xf32> to vector<4x16xf32>
    %8 = vector.shape_cast %7 : vector<4x16xf32> to vector<4x16x1xf32>
    %c0_9 = arith.constant 0 : index
    %c0_10 = arith.constant 0 : index
    %9 = vector.load %arg4[%c0_9, %c0_10] : memref<1x32xf32, #tpu.memory_space<vmem>>, vector<1x32xf32>
    %10 = vector.shape_cast %9 : vector<1x32xf32> to vector<1x1x32xf32>
    %11 = vector.broadcast %8 : vector<4x16x1xf32> to vector<4x16x32xf32>
    %12 = vector.broadcast %10 : vector<1x1x32xf32> to vector<4x16x32xf32>
    %13 = arith.mulf %11, %12 : vector<4x16x32xf32>
    %14 = arith.addf %6, %13 : vector<4x16x32xf32>
    %cst_11 = arith.constant 0.000000e+00 : f32
    %15 = vector.broadcast %cst_11 : f32 to vector<4x16x32xf32>
    %16 = arith.maximumf %14, %15 : vector<4x16x32xf32>
    %17 = vector.shape_cast %16 : vector<4x16x32xf32> to vector<64x32xf32>
    %c0_12 = arith.constant 0 : index
    %c0_13 = arith.constant 0 : index
    %18 = vector.load %arg5[%c0_12, %c0_13] : memref<32x32xf32, #tpu.memory_space<vmem>>, vector<32x32xf32>
    %cst_14 = arith.constant dense<0.000000e+00> : vector<64x32xf32>
    %19 = tpu.matmul %17, %18, %cst_14 {dimension_numbers = #tpu.dot_dimension_numbers<[1], [1], [0], [0], [0, 0, 1, 0], [], []>} : vector<64x32xf32>, vector<32x32xf32>, vector<64x32xf32> -> vector<64x32xf32>
    %c0_15 = arith.constant 0 : index
    %c0_16 = arith.constant 0 : index
    %20 = vector.load %arg6[%c0_15, %c0_16] : memref<1x32xf32, #tpu.memory_space<vmem>>, vector<1x32xf32>
    %21 = vector.broadcast %20 : vector<1x32xf32> to vector<64x32xf32>
    %22 = arith.addf %19, %21 : vector<64x32xf32>
    %23 = vector.shape_cast %22 : vector<64x32xf32> to vector<4x16x32xf32>
    "tpu.trace_start"() <{level = 10 : i32, message = "bij,bjk->bik"}> : () -> ()
    %cst_17 = arith.constant dense<0.000000e+00> : vector<4x16x32xf32>
    %24 = tpu.matmul %1, %23, %cst_17 {dimension_numbers = #tpu.dot_dimension_numbers<[2], [1], [1], [2], [0, 0, 0, 1, 1, 2], [0], [0]>} : vector<4x16x16xf32>, vector<4x16x32xf32>, vector<4x16x32xf32> -> vector<4x16x32xf32>
    "tpu.trace_stop"() : () -> ()
    %25 = vector.shape_cast %24 : vector<4x16x32xf32> to vector<64x32xf32>
    %26 = vector.shape_cast %0 : vector<4x16x16xf32> to vector<64x16xf32>
    %c0_18 = arith.constant 0 : index
    %c0_19 = arith.constant 0 : index
    %27 = vector.load %arg7[%c0_18, %c0_19] : memref<32x16xf32, #tpu.memory_space<vmem>>, vector<32x16xf32>
    %cst_20 = arith.constant dense<0.000000e+00> : vector<64x32xf32>
    %28 = tpu.matmul %26, %27, %cst_20 {dimension_numbers = #tpu.dot_dimension_numbers<[1], [1], [0], [0], [0, 0, 1, 0], [], []>} : vector<64x16xf32>, vector<32x16xf32>, vector<64x32xf32> -> vector<64x32xf32>
    %c0_21 = arith.constant 0 : index
    %c0_22 = arith.constant 0 : index
    %29 = vector.load %arg8[%c0_21, %c0_22] : memref<32x32xf32, #tpu.memory_space<vmem>>, vector<32x32xf32>
    %cst_23 = arith.constant dense<0.000000e+00> : vector<64x32xf32>
    %30 = tpu.matmul %28, %29, %cst_23 {dimension_numbers = #tpu.dot_dimension_numbers<[1], [1], [0], [0], [0, 0, 1, 0], [], []>} : vector<64x32xf32>, vector<32x32xf32>, vector<64x32xf32> -> vector<64x32xf32>
    %c0_24 = arith.constant 0 : index
    %c0_25 = arith.constant 0 : index
    %31 = vector.load %arg9[%c0_24, %c0_25] : memref<1x32xf32, #tpu.memory_space<vmem>>, vector<1x32xf32>
    %32 = vector.broadcast %31 : vector<1x32xf32> to vector<64x32xf32>
    %33 = arith.addf %30, %32 : vector<64x32xf32>
    %c0_26 = arith.constant 0 : index
    %c0_27 = arith.constant 0 : index
    %34 = vector.load %arg10[%c0_26, %c0_27] : memref<32x32xf32, #tpu.memory_space<vmem>>, vector<32x32xf32>
    %cst_28 = arith.constant dense<0.000000e+00> : vector<64x32xf32>
    %35 = tpu.matmul %25, %34, %cst_28 {dimension_numbers = #tpu.dot_dimension_numbers<[1], [1], [0], [0], [0, 0, 1, 0], [], []>} : vector<64x32xf32>, vector<32x32xf32>, vector<64x32xf32> -> vector<64x32xf32>
    %c0_29 = arith.constant 0 : index
    %c0_30 = arith.constant 0 : index
    %36 = vector.load %arg11[%c0_29, %c0_30] : memref<1x32xf32, #tpu.memory_space<vmem>>, vector<1x32xf32>
    %37 = vector.broadcast %36 : vector<1x32xf32> to vector<64x32xf32>
    %38 = arith.addf %35, %37 : vector<64x32xf32>
    %39 = arith.addf %33, %38 : vector<64x32xf32>
    %40 = arith.negf %39 : vector<64x32xf32>
    %41 = math.exp %40 : vector<64x32xf32>
    %cst_31 = arith.constant 1.000000e+00 : f32
    %42 = vector.broadcast %cst_31 : f32 to vector<64x32xf32>
    %43 = arith.addf %42, %41 : vector<64x32xf32>
    %44 = arith.divf %42, %43 : vector<64x32xf32>
    %45 = arith.mulf %44, %25 : vector<64x32xf32>
    %cst_32 = arith.constant 1.000000e+00 : f32
    %46 = vector.broadcast %cst_32 : f32 to vector<64x32xf32>
    %47 = arith.subf %46, %44 : vector<64x32xf32>
    %48 = arith.mulf %47, %28 : vector<64x32xf32>
    %49 = arith.addf %45, %48 : vector<64x32xf32>
    %cst_33 = arith.constant 0.000000e+00 : f32
    %50 = vector.broadcast %cst_33 : f32 to vector<64x32xf32>
    %51 = arith.maximumf %49, %50 : vector<64x32xf32>
    %52 = vector.shape_cast %51 : vector<64x32xf32> to vector<4x16x32xf32>
    %c0_34 = arith.constant 0 : index
    %c0_35 = arith.constant 0 : index
    %c0_36 = arith.constant 0 : index
    %53 = vector.load %arg12[%c0_34, %c0_35, %c0_36] : memref<4x16x32xf32, #tpu.memory_space<vmem>>, vector<4x16x32xf32>
    tpu.vector_store %arg12[%c0_34, %c0_35, %c0_36], %52 {strides = array<i32>} : memref<4x16x32xf32, #tpu.memory_space<vmem>>, vector<4x16x32xf32>,
    return
  }
  func.func @transform_0(%arg0: i32) -> (i32, i32, i32) {
    %c0_i32 = arith.constant 0 : i32
    %c0_i32_0 = arith.constant 0 : i32
    %c0_i32_1 = arith.constant 0 : i32
    return %arg0, %c0_i32, %c0_i32_0 : i32, i32, i32
  }
  func.func @transform_1(%arg0: i32) -> (i32, i32, i32) {
    %c0_i32 = arith.constant 0 : i32
    %c0_i32_0 = arith.constant 0 : i32
    %c0_i32_1 = arith.constant 0 : i32
    return %arg0, %c0_i32, %c0_i32_0 : i32, i32, i32
  }
  func.func @transform_2(%arg0: i32) -> (i32, i32) {
    %c0_i32 = arith.constant 0 : i32
    %c0_i32_0 = arith.constant 0 : i32
    %c0_i32_1 = arith.constant 0 : i32
    return %c0_i32, %c0_i32_0 : i32, i32
  }
  func.func @transform_3(%arg0: i32) -> (i32, i32) {
    %c0_i32 = arith.constant 0 : i32
    %c0_i32_0 = arith.constant 0 : i32
    %c0_i32_1 = arith.constant 0 : i32
    return %c0_i32, %c0_i32_0 : i32, i32
  }
  func.func @transform_4(%arg0: i32) -> (i32, i32) {
    %c0_i32 = arith.constant 0 : i32
    %c0_i32_0 = arith.constant 0 : i32
    %c0_i32_1 = arith.constant 0 : i32
    return %c0_i32, %c0_i32_0 : i32, i32
  }
  func.func @transform_5(%arg0: i32) -> (i32, i32) {
    %c0_i32 = arith.constant 0 : i32
    %c0_i32_0 = arith.constant 0 : i32
    %c0_i32_1 = arith.constant 0 : i32
    return %c0_i32, %c0_i32_0 : i32, i32
  }
  func.func @transform_6(%arg0: i32) -> (i32, i32) {
    %c0_i32 = arith.constant 0 : i32
    %c0_i32_0 = arith.constant 0 : i32
    %c0_i32_1 = arith.constant 0 : i32
    return %c0_i32, %c0_i32_0 : i32, i32
  }
  func.func @transform_7(%arg0: i32) -> (i32, i32) {
    %c0_i32 = arith.constant 0 : i32
    %c0_i32_0 = arith.constant 0 : i32
    %c0_i32_1 = arith.constant 0 : i32
    return %c0_i32, %c0_i32_0 : i32, i32
  }
  func.func @transform_8(%arg0: i32) -> (i32, i32) {
    %c0_i32 = arith.constant 0 : i32
    %c0_i32_0 = arith.constant 0 : i32
    %c0_i32_1 = arith.constant 0 : i32
    return %c0_i32, %c0_i32_0 : i32, i32
  }
  func.func @transform_9(%arg0: i32) -> (i32, i32) {
    %c0_i32 = arith.constant 0 : i32
    %c0_i32_0 = arith.constant 0 : i32
    %c0_i32_1 = arith.constant 0 : i32
    return %c0_i32, %c0_i32_0 : i32, i32
  }
  func.func @transform_10(%arg0: i32) -> (i32, i32) {
    %c0_i32 = arith.constant 0 : i32
    %c0_i32_0 = arith.constant 0 : i32
    %c0_i32_1 = arith.constant 0 : i32
    return %c0_i32, %c0_i32_0 : i32, i32
  }
  func.func @transform_11(%arg0: i32) -> (i32, i32, i32) {
    %c0_i32 = arith.constant 0 : i32
    %c0_i32_0 = arith.constant 0 : i32
    %c0_i32_1 = arith.constant 0 : i32
    return %arg0, %c0_i32, %c0_i32_0 : i32, i32, i32
  }
}

</mosaic_0001>

<bundles_post_ra>
// kernel: tpu_custom_call.1
= control target key start
LH: loop header
LB: loop body
LE: loop exit
PB: predicated region body
PF: predicated region fallthrough
CT: control target
= control target key end

     0   :  { %s3349_s0 = inlined_call_operand.hbm [shape: f32[8,16,16], index: 0, kind: input, shape index: {}]   ;;  %s3350_s1 = inlined_call_operand.hbm [shape: f32[8,16,16], index: 1, kind: input, shape index: {}]   ;;  %s3351_s2 = inlined_call_operand.vmem [shape: f32[32,16], index: 2, kind: input, shape index: {}]   ;;  %s3352_s3 = inlined_call_operand.vmem [shape: f32[1,32], index: 3, kind: input, shape index: {}]   ;;  %s3353_s4 = inlined_call_operand.vmem [shape: f32[32,32], index: 4, kind: input, shape index: {}]   ;;  %s3354_s5 = inlined_call_operand.vmem [shape: f32[1,32], index: 5, kind: input, shape index: {}]   ;;  %s3355_s6 = inlined_call_operand.vmem [shape: f32[32,16], index: 6, kind: input, shape index: {}]   ;;  %s3356_s7 = inlined_call_operand.vmem [shape: f32[32,32], index: 7, kind: input, shape index: {}]   ;;  %s3357_s8 = inlined_call_operand.vmem [shape: f32[1,32], index: 8, kind: input, shape index: {}]   ;;  %s3358_s9 = inlined_call_operand.vmem [shape: f32[32,32], index: 9, kind: input, shape index: {}]   ;;  %s3359_s10 = inlined_call_operand.vmem [shape: f32[1,32], index: 10, kind: input, shape index: {}]   ;;  %s3360_s11 = inlined_call_operand.hbm [shape: f32[8,16,32], index: 11, kind: output, shape index: {}]  }
   0x1   :  { %3371 = sst [smem:[#allocation16_spill]] %s3349_s0 }
   0x2   :  { %16 = vsyncpa [#allocation3], 0 }
   0x3   :  { %18 = vsyncpa [#allocation3 + $0x1], 0 }
   0x4   :  { %19 = vsyncpa [#allocation6], 0 }
   0x5   :  { %21 = vsyncpa [#allocation6 + $0x1], 0 }
   0x6   :  { %22 = vsyncpa [#allocation4], 0 }
   0x7   :  { %24 = vsyncpa [#allocation4 + $0x1], 0  ;;  %s2759_s17 = smov 0   ;;  %s2761_s18 = smov 0  }
   0x8   :  { %s2763_s19 = smov 0   ;;  %s2765_s20 = smov 0  }
   0x9 LB: > { %3372 = sst [smem:[#allocation11_spill]] %s2678_s17  ;;  %s2780_s21 = sadd.s32 4294967295, %s2690_s20   ;;  %s2690_s20 = sphi %s2765_s20, %s3394_s20   ;;  %s2686_s19 = sphi %s2763_s19, %s3396_s19   ;;  %s2682_s18 = sphi %s2761_s18, %s3398_s18   ;;  %s2678_s17 = sphi %s2759_s17, %s3397_s17  }
   0xa   : > { %3373 = sst [smem:[#allocation12_spill]] %s2686_s19  ;;  %s2108_s22 = sadd.s32 4294967294, %s2690_s20  }
   0xb   : > { %s2784_s23 = sadd.s32 1, %s2690_s20   ;;  %s37_s24 = sadd.s32 1, %s2686_s19 }
   0xc   : > { %3374 = sst [smem:[#allocation13_spill]] %s2784_s23  ;;  %s34_s25 = ssub.s32 %s2690_s20, %s2784_s23 }
   0xd   : > { %p44_p0 = scmp.ne.s32.totalorder %s2686_s19, %s2682_s18  ;;  %p35_p1 = scmp.eq.s32.totalorder %s34_s25, 0 }
   0xe   : > { %p45_p2 = scmp.eq.s32.totalorder %s2690_s20, 0  ;;  %p50_p3 = scmp.ne.s32.totalorder %s2682_s18, %s2678_s17 }
   0xf   : > { %p51_p4 = scmp.eq.s32.totalorder %s2780_s21, 0  ;;  %p289_p7 = scmp.eq.s32.totalorder %s2780_s21, 1 }
  0x10   : > { %s2796_s26 = scalar_select %p35_p1, %s2686_s19, %s37_s24  }
  0x11   : > { %p2798_p5 = por %p45_p2, %p44_p0  ;;  %p2802_p6 = por %p51_p4, %p50_p3 }
  0x12   : > { %3375 = sst [smem:[#allocation14_spill]] %s2796_s26  ;;  %p295_p8 = scmp.eq.s32.totalorder %s2108_s22, 1 }
  0x13   : > { %s3377_s28 = scalar_select %p2802_p6, 1, 0 }
  0x14   : > { %p2496_p10 = scmp.lt.s32.totalorder %s2690_s20, 2  ;;  %p2809_p11 = por %p289_p7, %p44_p0 }
  0x15   : > { %p2813_p12 = por %p295_p8, %p50_p3  ;;  %s2818_s12 = sand.u32 1, %s2686_s19  }
  0x16   : > { %s3378_s29 = scalar_select %p2809_p11, 1, 0 }
  0x17   : > { %s3379_s30 = scalar_select %p2813_p12, 1, 0 }
  0x18   : > { %s3365_s13 = sshll.u32 %s2690_s20, 10  ;;  %s3364_s14 = sshll.u32 %s2818_s12, 6 }
  0x19   : > { %3380 = sst [smem:[#allocation15_spill]] %s3379_s30  ;;  %s346_s24 = scalar_lea.vmem [#allocation2], %s3364_s14 }
  0x1a   : > { %s3381_s0 = sld [smem:[#allocation16_spill]]  ;;  %s354_s25 = sshll.u32 %s346_s24, 4  ;;  %s2837_s25 = int_to_ptr.vmem [resolvable:$true] %s354_s25 }
  0x1b   : > { %p2833_p13 = pnand %p2496_p10, %p2798_p5 }
  0x1d   : > { %p2568_p1 = pneg %p2833_p13 }
  0x20   : > { %s2827_s22 = scalar_lea.hbm %s3381_s0, %s3365_s13  ;;  %s2571_s27 = scalar_lea.hbm %s3381_s0, 2048 }
  0x21   : > { %s2566_s23 = scalar_lea.hbm %s2827_s22, 1024  ;;  %p2572_p4 = scmp.lt.s32.totalorder %s2827_s22, %s3381_s0 }
  0x22   : > { %p2567_p0 = scmp.ne.s32.totalorder %s2827_s22, %s2566_s23  ;;  %p2573_p5 = scmp.lt.s32.totalorder %s2571_s27, %s2566_s23 }
  0x24   : > { %p2569_p2 = pnand %p2568_p1, %p2567_p0  ;;  %p2574_p7 = por %p2573_p5, %p2572_p4 }
  0x26   : > { %p2570_p3 = pneg %p2569_p2 }
  0x28   : > { %p2575_p8 = pnand %p2574_p7, %p2570_p3 }
  0x2a   : > { %2578 = shalt.err (!%p2575_p8)
}
  0x2b   : > { %s2579_s13 = scalar_lea.vmem %s2837_s25, 1024  ;;  %s2692_s15 = smov [#allocation2]  }
  0x2c   : > { %p2580_p10 = scmp.ne.s32.totalorder %s2837_s25, %s2579_s13  ;;  %s2584_s16 = sshll.u32 %s2692_s15, 4  ;;  %s2585_s16 = int_to_ptr.vmem [resolvable:$false] %s2584_s16 }
  0x2d   : > { %s2586_s19 = scalar_lea.vmem %s2585_s16, 2048  ;;  %p2587_p9 = scmp.lt.s32.totalorder %s2837_s25, %s2585_s16 }
  0x2e   : > { %p2582_p0 = pnand %p2580_p10, %p2568_p1  ;;  %p2588_p12 = scmp.lt.s32.totalorder %s2586_s19, %s2579_s13 }
  0x30   : > { %p2583_p2 = pneg %p2582_p0  ;;  %p2589_p11 = por %p2588_p12, %p2587_p9 }
  0x32   : > { %p2590_p4 = pnand %p2589_p11, %p2583_p2 }
  0x34   : > { %2593 = shalt.err (!%p2590_p4)
}
  0x35   : > { %s3369_s23 = smov 128   ;;  %s2694_s14 = smov 8  }
  0x36   : > { %s3383_s19 = scalar_lea.sflag [#allocation3], %s2818_s12  ;;  %p2119_p9 = scmp.ge.s32.totalorder %s2690_s20, 1 }
  0x37   : > { %2488 = dma.hbm_to_vmem [thread:$0]  (!%p2833_p13), %s2827_s22, 1024, %s2837_s25, %s3383_s19, %s3369_s23, %s3369_s23, %s2694_s14  }
  0x38   : > { %p384_p11 = scmp.lt.s32.totalorder %s2690_s20, 3  ;;  %s3385_s27 = sshll.u32 %s2690_s20, 10 }
  0x39   : > { %s2880_s16 = scalar_lea.hbm %s3350_s1, %s3385_s27  ;;  %s3386_s0 = sshll.u32 %s2818_s12, 6 }
  0x3a   : > { %p2871_p12 = pnand %p2119_p9, %p384_p11  ;;  %s368_s30 = scalar_lea.vmem [#allocation5], %s3386_s0 }
  0x3b   : > { %s376_s17 = sshll.u32 %s368_s30, 4  ;;  %s365_s22 = scalar_lea.sflag [#allocation6], %s2818_s12  ;;  %s2884_s17 = int_to_ptr.vmem [resolvable:$true] %s376_s17 }
  0x3c   : > { %s2594_s25 = scalar_lea.hbm %s2880_s16, 1024  ;;  %s2599_s27 = scalar_lea.hbm %s3350_s1, 2048 }
  0x3d   : > { %p2595_p3 = scmp.ne.s32.totalorder %s2880_s16, %s2594_s25  ;;  %p2600_p8 = scmp.lt.s32.totalorder %s2880_s16, %s3350_s1 }
  0x3e   : > { %p2601_p10 = scmp.lt.s32.totalorder %s2599_s27, %s2594_s25 }
  0x3f   : > { %p2597_p5 = pnand %p2595_p3, %p2568_p1 }
  0x40   : > { %p2602_p0 = por %p2601_p10, %p2600_p8 }
  0x41   : > { %p2598_p7 = pneg %p2597_p5 }
  0x43   : > { %p2603_p2 = pnand %p2602_p0, %p2598_p7 }
  0x45   : > { %2606 = shalt.err (!%p2603_p2)
}
  0x46   : > { %s2607_s0 = scalar_lea.vmem %s2884_s17, 1024  ;;  %s2695_s30 = smov [#allocation5]  }
  0x47   : > { %p2608_p4 = scmp.ne.s32.totalorder %s2884_s17, %s2607_s0  ;;  %s2612_s12 = sshll.u32 %s2695_s30, 4  ;;  %s2613_s12 = int_to_ptr.vmem [resolvable:$false] %s2612_s12 }
  0x48   : > { %s2614_s23 = scalar_lea.vmem %s2613_s12, 2048  ;;  %p2615_p3 = scmp.lt.s32.totalorder %s2884_s17, %s2613_s12 }
  0x49   : > { %p2610_p9 = pnand %p2608_p4, %p2568_p1  ;;  %p2616_p5 = scmp.lt.s32.totalorder %s2614_s23, %s2607_s0 }
  0x4b   : > { %p2611_p11 = pneg %p2610_p9  ;;  %p2617_p6 = por %p2616_p5, %p2615_p3 }
  0x4d   : > { %p2618_p8 = pnand %p2617_p6, %p2611_p11 }
  0x4f   : > { %2621 = shalt.err (!%p2618_p8)
}
  0x50   : > { %s3387_s25 = smov 128   ;;  %388 = sbr.rel (%p2871_p12) target bundleno = 1182 (0x49e), region = 64 }
  0x51   : > { %2491 = dma.hbm_to_vmem [thread:$0]  (!%p2833_p13), %s2880_s16, 1024, %s2884_s17, %s365_s22, %s3387_s25, %s3387_s25, %s2694_s14  }
  0x52   : > { %s2915_s19 = sand.u32 (!%p2871_p12), 1, %s2682_s18   ;;  %p3388_p6 = scmp.ne.s32.totalorder (!%p2871_p12), %s3377_s28, 0 }
  0x53   : > { %s2918_s27 = sshll.u32 (!%p2871_p12), %s2915_s19, 6  ;;  %s391_s24 = scalar_lea.sflag (!%p2871_p12), [#allocation3], %s2915_s19 }
  0x54   : > { %s2922_s26 = scalar_lea.vmem (!%p2871_p12), [#allocation2], %s2918_s27 }
  0x55   : > { %2665 = dma.done.wait (%p3388_p6), %s391_s24, 1024  }
  0x56   : > { %2667 = vsyncadd (%p3388_p6), %s391_s24, 4294966272  ;;  %s400_s17 = scalar_lea.sflag [#allocation6], %s2915_s19  ;;  %s2930_s14 = scalar_lea.vmem [#allocation5], %s2918_s27 }
  0x57   : > { %2669 = dma.done.wait (%p3388_p6), %s400_s17, 1024  }
  0x58   : > { %2671 = vsyncadd (%p3388_p6), %s400_s17, 4294966272  ;;  %vm466_vm0 = vcmask 130048   ;;  %v2937_v0 = vld [vmem:[%s2922_s26 + $0x8] sm:$0xff]  ;;  %v2940_v1 = vld [vmem:[%s2922_s26] sm:$0xff]  ;;  %vm1002_vm1 = vcmask 261120   ;;  %s3271_s30 = scalar_lea.vmem [#allocation7], %s2918_s27 }
  0x59   : > { %v2943_v2 = vld [vmem:[%s2930_s14] sm:$0xff]  ;;  %2315 = vmatprep.subr.mxu0 %v2937_v0  ;;  %v2949_v3 = vld [vmem:[%s2922_s26 + $0x18] sm:$0xff]  ;;  %v2952_v4 = vld [vmem:[%s2922_s26 + $0x10] sm:$0xff]  ;;  %s2222_s27 = sshll.u32 %s2780_s21, 10  ;;  %s2012_s12 = sshll.u32 %s3271_s30, 4  ;;  %s3304_s12 = int_to_ptr.vmem [resolvable:$true] %s2012_s12 }
  0x5a   : > { %2319 = vmatprep.mubr.msk.f32.mxu0 %vm466_vm0, %v2943_v2  ;;  %2316 = vmatpush3.msra.mxu0 %v2937_v0  ;;  %v2956_v5 = vld [vmem:[%s2930_s14 + $0x8] sm:$0xff]  ;;  %v2962_v6 = vld [vmem:[%s2930_s14 + $0x10] sm:$0xff]  ;;  %v2970_v8 = vld [vmem:[%s2930_s14 + $0x18] sm:$0xff]  ;;  %v936_v20 = vsel %vm466_vm0, %v2943_v2, 0.0  ;;  %s3302_s24 = scalar_lea.hbm %s3360_s11, %s2222_s27  ;;  %s1998_s21 = scalar_lea.sflag [#allocation4], %s2915_s19 }
  0x5b   : > { %2322 = vmatprep.subr.mxu1 %v2949_v3  ;;  %2317 = vmatprep.subr.mxu0 %v2940_v1  ;;  %v2965_v7 = vld [vmem:[%s2922_s26 + $0x28] sm:$0xff]  ;;  %v2976_v9 = vld [vmem:[%s2922_s26 + $0x20] sm:$0xff]  ;;  %v2985_v11 = vld [vmem:[%s2922_s26 + $0x38] sm:$0xff]  ;;  %v942_v21 = vsel %vm466_vm0, %v2962_v6, 0.0  ;;  %v939_v23 = vsel %vm466_vm0, %v2956_v5, 0.0  ;;  %v945_v24 = vsel %vm466_vm0, %v2970_v8, 0.0 }
  0x5c   : > { %2323 = vmatpush3.msra.mxu1 %v2949_v3  ;;  %2318 = vmatpush3.msra.mxu0 %v2940_v1  ;;  %v2979_v10 = vld [vmem:[%s2930_s14 + $0x20] sm:$0xff]  ;;  %v2991_v12 = vld [vmem:[%s2930_s14 + $0x28] sm:$0xff]  ;;  %v2997_v13 = vld [vmem:[%s2922_s26 + $0x30] sm:$0xff]  ;;  %s2622_s26 = scalar_lea.vmem %s3304_s12, 1024  ;;  %p3389_p1 = scmp.ne.s32.totalorder %s3378_s29, 0 }
  0x5d   : > { %2324 = vmatprep.subr.mxu1 %v2952_v4  ;;  %2320 = vmatmul.mubr.msk.f32.vlgmr.msra.gmra.mxu0 %vm466_vm0, %v2956_v5  ;;  %v3000_v14 = vld [vmem:[%s2930_s14 + $0x30] sm:$0xff]  ;;  %v794_v15 = vld [vmem:[%s3351_s2 + $0x18] sm:$0xff]  ;;  %v792_v18 = vld [vmem:[%s3351_s2 + $0x8] sm:$0xff]  ;;  %v948_v25 = vsel %vm466_vm0, %v2979_v10, 0.0  ;;  %v951_v26 = vsel %vm466_vm0, %v2991_v12, 0.0  ;;  %p2623_p13 = scmp.ne.s32.totalorder %s3304_s12, %s2622_s26  ;;  %s2696_s17 = smov [#allocation7]  }
  0x5e   : > { %2325 = vmatpush3.msra.mxu1 %v2952_v4  ;;  %2326 = vmatprep.mubr.msk.f32.mxu1 %vm466_vm0, %v2962_v6  ;;  %v3011_v16 = vld [vmem:[%s2930_s14 + $0x38] sm:$0xff]  ;;  %v793_v17 = vld [vmem:[%s3351_s2 + $0x10] sm:$0xff]  ;;  %v791_v19 = vld [vmem:[%s3351_s2] sm:$0xff]  ;;  %v954_v27 = vsel %vm466_vm0, %v3000_v14, 0.0  ;;  %s2626_s14 = sshll.u32 %s2696_s17, 4  ;;  %s2627_s14 = int_to_ptr.vmem [resolvable:$false] %s2626_s14 }
  0x5f   : > { %2329 = vmatprep.subr.mxu0 %v2965_v7  ;;  %2327 = vmatmul.mubr.msk.f32.vlgmr.msra.gmra.mxu1 %vm466_vm0, %v2970_v8  ;;  %v994_v22 = vld [vmem:[%s3353_s4 + $0x18] sm:$0xff]  ;;  %v957_v28 = vsel %vm466_vm0, %v3011_v16, 0.0  ;;  %v993_v29 = vld [vmem:[%s3353_s4 + $0x10] sm:$0xff]  ;;  %v992_v38 = vld [vmem:[%s3353_s4 + $0x8] sm:$0xff]  ;;  %p2624_p12 = pnand %p2623_p13, %p3389_p1  ;;  %s2628_s28 = scalar_lea.vmem %s2627_s14, 2048 }
  0x60   : > { %2330 = vmatpush3.msra.mxu0 %v2965_v7  ;;  %2333 = vmatprep.mubr.msk.f32.mxu0 %vm466_vm0, %v2979_v10  ;;  %v991_v39 = vld [vmem:[%s3353_s4] sm:$0xff]  ;;  %p2629_p10 = scmp.lt.s32.totalorder %s3304_s12, %s2627_s14  ;;  %p2630_p0 = scmp.lt.s32.totalorder %s2628_s28, %s2622_s26 }
  0x61   : > { %2331 = vmatprep.subr.mxu0 %v2976_v9  ;;  %2336 = vmatprep.subr.mxu1 %v2985_v11  ;;  %v2143_v42 = vld [vmem:[%s3352_s3] ss:$0 sm:$0xff]  ;;  %p2625_p7 = pneg %p2624_p12 }
  0x62   : > { %2332 = vmatpush3.msra.mxu0 %v2976_v9  ;;  %2337 = vmatpush3.msra.mxu1 %v2985_v11  ;;  %p2631_p2 = por %p2630_p0, %p2629_p10 }
  0x63   : > { %2334 = vmatmul.mubr.msk.f32.vlgmr.msra.gmra.mxu0 %vm466_vm0, %v2991_v12  ;;  %2338 = vmatprep.subr.mxu1 %v2997_v13 }
  0x64   : > { %2340 = vmatprep.mubr.msk.f32.mxu1 %vm466_vm0, %v3000_v14  ;;  %2339 = vmatpush3.msra.mxu1 %v2997_v13  ;;  %p2632_p4 = pnand %p2631_p2, %p2625_p7 }
  0x65   : > { %2343 = vmatprep.subr.msk.mxu0 %vm466_vm0, %v794_v15  ;;  %2341 = vmatmul.mubr.msk.f32.vlgmr.msra.gmra.mxu1 %vm466_vm0, %v3011_v16 }
  0x66   : > { %2344 = vmatpush3.xpose.msk.msra.mxu0 %vm466_vm0, %v794_v15  ;;  %937 = vadd.xlane.f32.xlu0 %v936_v20 }
  0x67   : > { %2345 = vmatprep.subr.msk.mxu0 %vm466_vm0, %v793_v17  ;;  %943 = vadd.xlane.f32.xlu1 %v942_v21 }
  0x68   : > { %2363 = vmatprep.subr.msk.mxu1 %vm1002_vm1, %v994_v22 }
  0x69   : > { %2364 = vmatpush3.xpose.msk.msra.mxu1 %vm1002_vm1, %v994_v22 }
  0x6a   : > { %2346 = vmatpush3.xpose.msk.msra.mxu0 %vm466_vm0, %v793_v17  ;;  %940 = vadd.xlane.f32.xlu0 %v939_v23 }
  0x6b   : > { %2347 = vmatprep.subr.msk.mxu0 %vm466_vm0, %v792_v18  ;;  %946 = vadd.xlane.f32.xlu1 %v945_v24 }
  0x6c   : > { %2365 = vmatprep.subr.msk.mxu1 %vm1002_vm1, %v993_v29 }
  0x6d   : > { %2366 = vmatpush3.xpose.msk.msra.mxu1 %vm1002_vm1, %v993_v29 }
  0x6e   : > { %2348 = vmatpush3.xpose.msk.msra.mxu0 %vm466_vm0, %v792_v18  ;;  %949 = vadd.xlane.f32.xlu0 %v948_v25 }
  0x6f   : > { %2349 = vmatprep.subr.msk.mxu0 %vm466_vm0, %v791_v19  ;;  %952 = vadd.xlane.f32.xlu1 %v951_v26 }
  0x70   : > { %2367 = vmatprep.subr.msk.mxu1 %vm1002_vm1, %v992_v38 }
  0x71   : > { %2368 = vmatpush3.xpose.msk.msra.mxu1 %vm1002_vm1, %v992_v38 }
  0x72   : > { %2350 = vmatpush3.xpose.msk.msra.mxu0 %vm466_vm0, %v791_v19  ;;  %955 = vadd.xlane.f32.xlu0 %v954_v27 }
  0x73   : > { %958 = vadd.xlane.f32.xlu1 %v957_v28  ;;  %2369 = vmatprep.subr.msk.mxu1 %vm1002_vm1, %v991_v39 }
  0x75   : > { %2370 = vmatpush3.xpose.msk.msra.mxu1 %vm1002_vm1, %v991_v39 }
  0xef   : > { %v938_v40 = vpop.xlane.xlu0 %937 }
  0xf0   : > { %v944_v41 = vpop.xlane.xlu1 %943  ;;  %v967_v47 = vmul.f32 %v2143_v42, %v938_v40 }
  0xf1   : > { %v969_v55 = vmul.f32 %v2143_v42, %v944_v41 }
  0xf3   : > { %v941_v43 = vpop.xlane.xlu0 %940 }
  0xf4   : > { %v947_v44 = vpop.xlane.xlu1 %946  ;;  %v968_v45 = vmul.f32 %v2143_v42, %v941_v43 }
  0xf5   : > { %v970_v50 = vmul.f32 %v2143_v42, %v947_v44  ;;  %v1447_v44 = vld [vmem:[%s3355_s6 + $0x18] sm:$0xff] }
  0xf7   : > { %v950_v54 = vpop.xlane.xlu0 %949 }
  0xf8   : > { %v953_v51 = vpop.xlane.xlu1 %952  ;;  %v971_v63 = vmul.f32 %v2143_v42, %v950_v54 }
  0xf9   : > { %v972_v60 = vmul.f32 %v2143_v42, %v953_v51 }
  0xfb   : > { %v956_v15 = vpop.xlane.xlu0 %955 }
  0xfc   : > { %v959_v61 = vpop.xlane.xlu1 %958  ;;  %v973_v23 = vmul.f32 %v2143_v42, %v956_v15  ;;  %v2177_v15 = vld [vmem:[%s3357_s8] ss:$0 sm:$0xff] }
  0xfd   : > { %v974_v18 = vmul.f32 %v2143_v42, %v959_v61 }
 0x11d   : > { %v2321_v30 = vpop.f32.mrf.mxu0 }
 0x11f   : > { %v539_v31 = vpop.f32.mrf.mxu0  ;;  %v2328_v32 = vpop.f32.mrf.mxu1 }
 0x120   : > { %2351 = vmatprep.mubr.msk.f32.mxu0 %vm466_vm0, %v539_v31 }
 0x121   : > { %2352 = vmatmul.mubr.msk.f32.vlgmr.msra.gmra.mxu0 %vm466_vm0, %v2321_v30  ;;  %v620_v33 = vpop.f32.mrf.mxu1 }
 0x122   : > { %2354 = vmatprep.mubr.msk.f32.mxu0 %vm466_vm0, %v620_v33 }
 0x123   : > { %v2335_v34 = vpop.f32.mrf.mxu0 }
 0x125   : > { %v701_v35 = vpop.f32.mrf.mxu0  ;;  %2355 = vmatmul.mubr.msk.f32.gmra.mxu0 %vm466_vm0, %v2328_v32  ;;  %v2342_v36 = vpop.f32.mrf.mxu1  ;;  %v2144_v32 = vld [vmem:[%s3354_s5] ss:$0 sm:$0xff] }
 0x126   : > { %2357 = vmatprep.mubr.msk.f32.mxu0 %vm466_vm0, %v701_v35 }
 0x127   : > { %v782_v37 = vpop.f32.mrf.mxu1 }
 0x129   : > { %2358 = vmatmul.mubr.msk.f32.gmra.mxu0 %vm466_vm0, %v2335_v34 }
 0x12a   : > { %2360 = vmatprep.mubr.msk.f32.mxu0 %vm466_vm0, %v782_v37 }
 0x12d   : > { %2361 = vmatmul.mubr.msk.f32.gmra.mxu0 %vm466_vm0, %v2342_v36 }
 0x12e   : > { %2387 = vmatprep.mubr.msk.f32.mxu0 %vm466_vm0, %v2943_v2 }
 0x1e1   : > { %v2353_v46 = vpop.f32.mrf.mxu0 }
 0x1e2   : > { %v976_v48 = vadd.f32 %v2353_v46, %v968_v45  ;;  %v1446_v45 = vld [vmem:[%s3355_s6 + $0x10] sm:$0xff] }
 0x1e3   : > { %v897_v49 = vpop.f32.mrf.mxu0 }
 0x1e4   : > { %v975_v52 = vadd.f32 %v967_v47, %v897_v49  ;;  %v984_v57 = vmax.f32 %v976_v48, 0.0  ;;  %v1742_v47 = vld [vmem:[%s3358_s9 + $0x8] sm:$0xff] }
 0x1e5   : > { %v2356_v53 = vpop.f32.mrf.mxu0 }
 0x1e6   : > { %v983_v56 = vmax.f32 %v975_v52, 0.0  ;;  %v978_v58 = vadd.f32 %v2356_v53, %v970_v50 }
 0x1e7   : > { %v907_v59 = vpop.f32.mrf.mxu0 }
 0x1e8   : > { %v977_v62 = vadd.f32 %v969_v55, %v907_v59  ;;  %2371 = vmatprep.mubr.msk.f32.mxu1 %vm1002_vm1, %v983_v56  ;;  %v986_v19 = vmax.f32 %v978_v58, 0.0 }
 0x1e9   : > { %v2359_v2 = vpop.f32.mrf.mxu0  ;;  %2372 = vmatmul.mubr.msk.f32.vlgmr.msra.gmra.mxu1 %vm1002_vm1, %v984_v57 }
 0x1ea   : > { %v985_v17 = vmax.f32 %v977_v62, 0.0  ;;  %v980_v20 = vadd.f32 %v2359_v2, %v972_v60  ;;  %v2190_v2 = vld [vmem:[%s3359_s10] ss:$0 sm:$0xff] }
 0x1eb   : > { %v917_v21 = vpop.f32.mrf.mxu0 }
 0x1ec   : > { %v979_v22 = vadd.f32 %v971_v63, %v917_v21  ;;  %2374 = vmatprep.mubr.msk.f32.mxu1 %vm1002_vm1, %v985_v17  ;;  %v988_v27 = vmax.f32 %v980_v20, 0.0 }
 0x1ed   : > { %2375 = vmatmul.mubr.msk.f32.gmra.mxu1 %vm1002_vm1, %v986_v19  ;;  %v2362_v24 = vpop.f32.mrf.mxu0 }
 0x1ee   : > { %v987_v25 = vmax.f32 %v979_v22, 0.0  ;;  %v982_v26 = vadd.f32 %v2362_v24, %v974_v18 }
 0x1ef   : > { %v927_v28 = vpop.f32.mrf.mxu0 }
 0x1f0   : > { %2377 = vmatprep.mubr.msk.f32.mxu1 %vm1002_vm1, %v987_v25  ;;  %v981_v29 = vadd.f32 %v973_v23, %v927_v28  ;;  %v990_v30 = vmax.f32 %v982_v26, 0.0 }
 0x1f1   : > { %2378 = vmatmul.mubr.msk.f32.gmra.mxu1 %vm1002_vm1, %v988_v27 }
 0x1f2   : > { %v989_v31 = vmax.f32 %v981_v29, 0.0 }
 0x1f4   : > { %2380 = vmatprep.mubr.msk.f32.mxu1 %vm1002_vm1, %v989_v31 }
 0x1f5   : > { %2381 = vmatmul.mubr.msk.f32.gmra.mxu1 %vm1002_vm1, %v990_v30 }
 0x1f6   : > { %2394 = vmatprep.mubr.msk.f32.mxu1 %vm466_vm0, %v2962_v6 }
 0x2a9   : > { %v2373_v33 = vpop.f32.mrf.mxu1 }
 0x2aa   : > { %v1111_v34 = vadd.f32 %v2373_v33, %v2144_v32 }
 0x2ab   : > { %v1105_v35 = vpop.f32.mrf.mxu1 }
 0x2ac   : > { %v1106_v36 = vadd.f32 %v2144_v32, %v1105_v35  ;;  %2383 = vmatprep.subr.mxu0 %v1111_v34 }
 0x2ad   : > { %v2376_v37 = vpop.f32.mrf.mxu1  ;;  %2384 = vmatpush3.msra.mxu0 %v1111_v34 }
 0x2ae   : > { %v1121_v38 = vadd.f32 %v2376_v37, %v2144_v32  ;;  %2385 = vmatprep.subr.mxu0 %v1106_v36 }
 0x2af   : > { %v1115_v39 = vpop.f32.mrf.mxu1  ;;  %2386 = vmatpush3.msra.mxu0 %v1106_v36 }
 0x2b0   : > { %v1116_v40 = vadd.f32 %v2144_v32, %v1115_v39  ;;  %2390 = vmatprep.subr.mxu1 %v1121_v38  ;;  %2388 = vmatmul.mubr.msk.f32.vlgmr.msra.gmra.mxu0 %vm466_vm0, %v2956_v5 }
 0x2b1   : > { %v2379_v6 = vpop.f32.mrf.mxu1  ;;  %2391 = vmatpush3.msra.mxu1 %v1121_v38  ;;  %2401 = vmatprep.mubr.msk.f32.mxu0 %vm466_vm0, %v2979_v10 }
 0x2b2   : > { %v1131_v41 = vadd.f32 %v2379_v6, %v2144_v32  ;;  %2392 = vmatprep.subr.mxu1 %v1116_v40 }
 0x2b3   : > { %v1125_v42 = vpop.f32.mrf.mxu1  ;;  %2393 = vmatpush3.msra.mxu1 %v1116_v40 }
 0x2b4   : > { %v1126_v43 = vadd.f32 %v2144_v32, %v1125_v42  ;;  %2397 = vmatprep.subr.mxu0 %v1131_v41  ;;  %2395 = vmatmul.mubr.msk.f32.vlgmr.msra.gmra.mxu1 %vm466_vm0, %v2970_v8 }
 0x2b5   : > { %2398 = vmatpush3.msra.mxu0 %v1131_v41  ;;  %v2382_v5 = vpop.f32.mrf.mxu1  ;;  %2408 = vmatprep.mubr.msk.f32.mxu1 %vm466_vm0, %v3000_v14  ;;  %v1445_v14 = vld [vmem:[%s3355_s6 + $0x8] sm:$0xff] }
 0x2b6   : > { %2399 = vmatprep.subr.mxu0 %v1126_v43  ;;  %v1141_v10 = vadd.f32 %v2382_v5, %v2144_v32 }
 0x2b7   : > { %2400 = vmatpush3.msra.mxu0 %v1126_v43  ;;  %v1135_v46 = vpop.f32.mrf.mxu1 }
 0x2b8   : > { %2411 = vmatprep.subr.msk.mxu0 %vm466_vm0, %v1447_v44  ;;  %2402 = vmatmul.mubr.msk.f32.vlgmr.msra.gmra.mxu0 %vm466_vm0, %v2991_v12  ;;  %v1136_v8 = vadd.f32 %v2144_v32, %v1135_v46  ;;  %v1744_v12 = vld [vmem:[%s3358_s9 + $0x18] sm:$0xff] }
 0x2b9   : > { %2412 = vmatpush3.xpose.msk.msra.mxu0 %vm466_vm0, %v1447_v44  ;;  %2419 = vmatprep.mubr.msk.f32.mxu0 %vm466_vm0, %v2940_v1  ;;  %v1444_v1 = vld [vmem:[%s3355_s6] sm:$0xff] }
 0x2ba   : > { %2413 = vmatprep.subr.msk.mxu0 %vm466_vm0, %v1446_v45  ;;  %2404 = vmatprep.subr.mxu1 %v1141_v10 }
 0x2bb   : > { %2405 = vmatpush3.msra.mxu1 %v1141_v10 }
 0x2bc   : > { %2406 = vmatprep.subr.mxu1 %v1136_v8 }
 0x2bd   : > { %2414 = vmatpush3.xpose.msk.msra.mxu0 %vm466_vm0, %v1446_v45  ;;  %2407 = vmatpush3.msra.mxu1 %v1136_v8 }
 0x2be   : > { %2415 = vmatprep.subr.msk.mxu0 %vm466_vm0, %v1445_v14  ;;  %2409 = vmatmul.mubr.msk.f32.vlgmr.msra.gmra.mxu1 %vm466_vm0, %v3011_v16  ;;  %v1743_v16 = vld [vmem:[%s3358_s9 + $0x10] sm:$0xff] }
 0x2c1   : > { %2416 = vmatpush3.xpose.msk.msra.mxu0 %vm466_vm0, %v1445_v14 }
 0x2c2   : > { %2417 = vmatprep.subr.msk.mxu0 %vm466_vm0, %v1444_v1 }
 0x2c5   : > { %2418 = vmatpush3.xpose.msk.msra.mxu0 %vm466_vm0, %v1444_v1 }
 0x2c6   : > { %2451 = vmatprep.subr.msk.mxu0 %vm1002_vm1, %v1744_v12 }
 0x2c8   : > { %2420 = vmatmul.mubr.msk.f32.vlgmr.msra.gmra.mxu0 %vm466_vm0, %v2937_v0  ;;  %v1741_v0 = vld [vmem:[%s3358_s9] sm:$0xff] }
 0x2c9   : > { %2422 = vmatprep.mubr.msk.f32.mxu0 %vm466_vm0, %v2952_v4  ;;  %2452 = vmatpush3.xpose.msk.msra.mxu0 %vm1002_vm1, %v1744_v12  ;;  %v1591_v4 = vld [vmem:[%s3356_s7 + $0x10] sm:$0xff] }
 0x2ca   : > { %2453 = vmatprep.subr.msk.mxu0 %vm1002_vm1, %v1743_v16 }
 0x2cc   : > { %2423 = vmatmul.mubr.msk.f32.gmra.mxu0 %vm466_vm0, %v2949_v3  ;;  %v1592_v3 = vld [vmem:[%s3356_s7 + $0x18] sm:$0xff] }
 0x2cd   : > { %2425 = vmatprep.mubr.msk.f32.mxu0 %vm466_vm0, %v2976_v9  ;;  %2454 = vmatpush3.xpose.msk.msra.mxu0 %vm1002_vm1, %v1743_v16  ;;  %v1589_v9 = vld [vmem:[%s3356_s7] sm:$0xff] }
 0x2ce   : > { %2455 = vmatprep.subr.msk.mxu0 %vm1002_vm1, %v1742_v47  ;;  %2431 = vmatprep.subr.msk.mxu1 %vm1002_vm1, %v1592_v3 }
 0x2cf   : > { %2432 = vmatpush3.xpose.msk.msra.mxu1 %vm1002_vm1, %v1592_v3 }
 0x2d0   : > { %2426 = vmatmul.mubr.msk.f32.gmra.mxu0 %vm466_vm0, %v2965_v7  ;;  %2433 = vmatprep.subr.msk.mxu1 %vm1002_vm1, %v1591_v4  ;;  %v1590_v7 = vld [vmem:[%s3356_s7 + $0x8] sm:$0xff] }
 0x2d1   : > { %2428 = vmatprep.mubr.msk.f32.mxu0 %vm466_vm0, %v2997_v13  ;;  %2456 = vmatpush3.xpose.msk.msra.mxu0 %vm1002_vm1, %v1742_v47 }
 0x2d2   : > { %2457 = vmatprep.subr.msk.mxu0 %vm1002_vm1, %v1741_v0 }
 0x2d3   : > { %2434 = vmatpush3.xpose.msk.msra.mxu1 %vm1002_vm1, %v1591_v4 }
 0x2d4   : > { %2429 = vmatmul.mubr.msk.f32.gmra.mxu0 %vm466_vm0, %v2985_v11  ;;  %2435 = vmatprep.subr.msk.mxu1 %vm1002_vm1, %v1590_v7 }
 0x2d5   : > { %2458 = vmatpush3.xpose.msk.msra.mxu0 %vm1002_vm1, %v1741_v0 }
 0x2d7   : > { %2436 = vmatpush3.xpose.msk.msra.mxu1 %vm1002_vm1, %v1590_v7 }
 0x2d8   : > { %2437 = vmatprep.subr.msk.mxu1 %vm1002_vm1, %v1589_v9 }
 0x2db   : > { %2438 = vmatpush3.xpose.msk.msra.mxu1 %vm1002_vm1, %v1589_v9 }
 0x2dc   : > { %2471 = vmatprep.subr.msk.mxu1 %vm1002_vm1, %v1744_v12 }
 0x370   : > { %v3187_v11 = vpop.f32.mrf.mxu0 }
 0x372   : > { %v3189_v13 = vpop.f32.mrf.mxu0 }
 0x373   : > { %2459 = vmatprep.mubr.msk.f32.mxu0 %vm1002_vm1, %v3189_v13 }
 0x374   : > { %2460 = vmatmul.mubr.msk.f32.vlgmr.msra.gmra.mxu0 %vm1002_vm1, %v3187_v11  ;;  %v3195_v48 = vpop.f32.mrf.mxu1 }
 0x376   : > { %v3197_v49 = vpop.f32.mrf.mxu1 }
 0x377   : > { %2462 = vmatprep.mubr.msk.f32.mxu0 %vm1002_vm1, %v3197_v49 }
 0x378   : > { %2463 = vmatmul.mubr.msk.f32.gmra.mxu0 %vm1002_vm1, %v3195_v48  ;;  %v3203_v50 = vpop.f32.mrf.mxu0 }
 0x37a   : > { %v3205_v51 = vpop.f32.mrf.mxu0 }
 0x37e   : > { %v3241_v60 = vpop.f32.mrf.mxu1 }
 0x380   : > { %v3250_v61 = vpop.f32.mrf.mxu1 }
 0x388   : > { %v3207_v52 = vpop.f32.mrf.mxu0 }
 0x38a   : > { %v3209_v53 = vpop.f32.mrf.mxu0 }
 0x38b   : > { %2439 = vmatprep.mubr.msk.f32.mxu1 %vm1002_vm1, %v3209_v53 }
 0x38c   : > { %v3213_v54 = vpop.f32.mrf.mxu0  ;;  %2440 = vmatmul.mubr.msk.f32.vlgmr.msra.gmra.mxu1 %vm1002_vm1, %v3207_v52 }
 0x38d   : > { %2475 = vmatpush3.xpose.msk.msra.mxu1 %vm1002_vm1, %v1744_v12 }
 0x38e   : > { %v3218_v55 = vpop.f32.mrf.mxu0  ;;  %2472 = vmatprep.subr.msk.mxu1 %vm1002_vm1, %v1743_v16 }
 0x38f   : > { %2442 = vmatprep.mubr.msk.f32.mxu1 %vm1002_vm1, %v3218_v55 }
 0x390   : > { %v3223_v56 = vpop.f32.mrf.mxu0  ;;  %2443 = vmatmul.mubr.msk.f32.gmra.mxu1 %vm1002_vm1, %v3213_v54 }
 0x391   : > { %2476 = vmatpush3.xpose.msk.msra.mxu1 %vm1002_vm1, %v1743_v16 }
 0x392   : > { %v3228_v57 = vpop.f32.mrf.mxu0  ;;  %2473 = vmatprep.subr.msk.mxu1 %vm1002_vm1, %v1742_v47 }
 0x393   : > { %2445 = vmatprep.mubr.msk.f32.mxu1 %vm1002_vm1, %v3228_v57 }
 0x394   : > { %v3233_v58 = vpop.f32.mrf.mxu0  ;;  %2446 = vmatmul.mubr.msk.f32.gmra.mxu1 %vm1002_vm1, %v3223_v56 }
 0x395   : > { %2477 = vmatpush3.xpose.msk.msra.mxu1 %vm1002_vm1, %v1742_v47 }
 0x396   : > { %v3238_v59 = vpop.f32.mrf.mxu0  ;;  %2474 = vmatprep.subr.msk.mxu1 %vm1002_vm1, %v1741_v0 }
 0x397   : > { %2448 = vmatprep.mubr.msk.f32.mxu1 %vm1002_vm1, %v3238_v59 }
 0x398   : > { %2449 = vmatmul.mubr.msk.f32.gmra.mxu1 %vm1002_vm1, %v3233_v58 }
 0x399   : > { %2478 = vmatpush3.xpose.msk.msra.mxu1 %vm1002_vm1, %v1741_v0  ;;  %2465 = vmatprep.mubr.msk.f32.mxu1 %vm1002_vm1, %v3205_v51 }
 0x39c   : > { %2466 = vmatmul.mubr.msk.f32.vlgmr.msra.gmra.mxu1 %vm1002_vm1, %v3203_v50 }
 0x39d   : > { %2468 = vmatprep.mubr.msk.f32.mxu1 %vm1002_vm1, %v3250_v61 }
 0x3a0   : > { %2469 = vmatmul.mubr.msk.f32.gmra.mxu1 %vm1002_vm1, %v3241_v60 }
 0x434   : > { %v2461_v62 = vpop.f32.mrf.mxu0 }
 0x435   : > { %v1860_v19 = vadd.f32 %v2461_v62, %v2190_v2 }
 0x436   : > { %v1854_v63 = vpop.f32.mrf.mxu0 }
 0x437   : > { %v1855_v23 = vadd.f32 %v2190_v2, %v1854_v63 }
 0x438   : > { %v2464_v17 = vpop.f32.mrf.mxu0 }
 0x439   : > { %v1870_v26 = vadd.f32 %v2464_v17, %v2190_v2 }
 0x43a   : > { %v1864_v22 = vpop.f32.mrf.mxu0 }
 0x43b   : > { %v1865_v31 = vadd.f32 %v2190_v2, %v1864_v22 }
 0x44c   : > { %v2441_v18 = vpop.f32.mrf.mxu1 }
 0x44d   : > { %v1708_v20 = vadd.f32 %v2441_v18, %v2177_v15 }
 0x44e   : > { %v1702_v21 = vpop.f32.mrf.mxu1 }
 0x44f   : > { %v1894_v24 = vadd.f32 %v1860_v19, %v1708_v20  ;;  %v1703_v25 = vadd.f32 %v2177_v15, %v1702_v21 }
 0x450   : > { %v2444_v27 = vpop.f32.mrf.mxu1 }
 0x451   : > { %v2204_v28 = vmul.f32 -1.442695, %v1894_v24  ;;  %v1893_v29 = vadd.f32 %v1855_v23, %v1703_v25  ;;  %v1718_v30 = vadd.f32 %v2444_v27, %v2177_v15 }
 0x452   : > { %v1712_v32 = vpop.f32.mrf.mxu1 }
 0x453   : > { %2534 = vpow2.f32 %v2204_v28  ;;  %v2203_v33 = vmul.f32 -1.442695, %v1893_v29  ;;  %v1896_v34 = vadd.f32 %v1870_v26, %v1718_v30  ;;  %v1713_v35 = vadd.f32 %v2177_v15, %v1712_v32 }
 0x454   : > { %v2447_v36 = vpop.f32.mrf.mxu1 }
 0x455   : > { %2536 = vpow2.f32 %v2203_v33  ;;  %v2206_v37 = vmul.f32 -1.442695, %v1896_v34  ;;  %v1895_v38 = vadd.f32 %v1865_v31, %v1713_v35  ;;  %v1728_v43 = vadd.f32 %v2447_v36, %v2177_v15 }
 0x456   : > { %v1722_v39 = vpop.f32.mrf.mxu1 }
 0x457   : > { %2538 = vpow2.f32 %v2206_v37  ;;  %v2205_v40 = vmul.f32 -1.442695, %v1895_v38  ;;  %v1723_v10 = vadd.f32 %v2177_v15, %v1722_v39 }
 0x458   : > { %v2450_v6 = vpop.f32.mrf.mxu1 }
 0x459   : > { %2540 = vpow2.f32 %v2205_v40  ;;  %v1738_v14 = vadd.f32 %v2450_v6, %v2177_v15 }
 0x45a   : > { %v1732_v41 = vpop.f32.mrf.mxu1 }
 0x45b   : > { %v1733_v17 = vadd.f32 %v2177_v15, %v1732_v41 }
 0x45c   : > { %v2467_v42 = vpop.f32.mrf.mxu1 }
 0x45d   : > { %v1880_v44 = vadd.f32 %v2467_v42, %v2190_v2 }
 0x45e   : > { %v1874_v5 = vpop.f32.mrf.mxu1 }
 0x45f   : > { %v1898_v45 = vadd.f32 %v1880_v44, %v1728_v43  ;;  %v1875_v46 = vadd.f32 %v2190_v2, %v1874_v5 }
 0x460   : > { %v2535_v8 = vpop.eup %2534  ;;  %v2470_v1 = vpop.f32.mrf.mxu1 }
 0x461   : > { %v1926_v12 = vadd.f32 1.0, %v2535_v8  ;;  %v2208_v16 = vmul.f32 -1.442695, %v1898_v45  ;;  %v1897_v47 = vadd.f32 %v1875_v46, %v1723_v10  ;;  %v1890_v0 = vadd.f32 %v2470_v1, %v2190_v2 }
 0x462   : > { %v2537_v3 = vpop.eup %2536  ;;  %v1884_v4 = vpop.f32.mrf.mxu1 }
 0x463   : > { %2542 = vrcp.f32 %v1926_v12  ;;  %v1925_v7 = vadd.f32 1.0, %v2537_v3  ;;  %v2207_v9 = vmul.f32 -1.442695, %v1897_v47  ;;  %v1900_v62 = vadd.f32 %v1890_v0, %v1738_v14 }
 0x464   : > { %v2539_v63 = vpop.eup %2538  ;;  %2544 = vpow2.f32 %v2208_v16  ;;  %v1885_v18 = vadd.f32 %v2190_v2, %v1884_v4 }
 0x465   : > { %2546 = vrcp.f32 %v1925_v7  ;;  %v1928_v19 = vadd.f32 1.0, %v2539_v63  ;;  %v2210_v20 = vmul.f32 -1.442695, %v1900_v62 }
 0x466   : > { %v2541_v21 = vpop.eup %2540  ;;  %2548 = vpow2.f32 %v2207_v9  ;;  %v1899_v22 = vadd.f32 %v1885_v18, %v1733_v17 }
 0x467   : > { %2550 = vrcp.f32 %v1928_v19  ;;  %v1927_v23 = vadd.f32 1.0, %v2541_v21 }
 0x468   : > { %2552 = vpow2.f32 %v2210_v20  ;;  %v2209_v24 = vmul.f32 -1.442695, %v1899_v22 }
 0x469   : > { %2554 = vrcp.f32 %v1927_v23 }
 0x46a   : > { %2556 = vpow2.f32 %v2209_v24 }
 0x470   : > { %v2543_v25 = vpop.eup %2542 }
 0x471   : > { %v2545_v26 = vpop.eup %2544  ;;  %v1958_v27 = vsub.f32 1.0, %v2543_v25  ;;  %v1950_v2 = vmul.f32 %v2543_v25, %v3187_v11 }
 0x472   : > { %v2547_v28 = vpop.eup %2546  ;;  %v1930_v29 = vadd.f32 1.0, %v2545_v26 }
 0x473   : > { %v2549_v15 = vpop.eup %2548  ;;  %v1966_v30 = vmul.f32 %v3207_v52, %v1958_v27  ;;  %v1957_v31 = vsub.f32 1.0, %v2547_v28  ;;  %v1949_v36 = vmul.f32 %v2547_v28, %v3189_v13 }
 0x474   : > { %v2551_v32 = vpop.eup %2550  ;;  %2558 = vrcp.f32 %v1930_v29  ;;  %v1929_v33 = vadd.f32 1.0, %v2549_v15 }
 0x475   : > { %v2553_v34 = vpop.eup %2552  ;;  %v1974_v35 = vadd.f32 %v1966_v30, %v1950_v2  ;;  %v1965_v37 = vmul.f32 %v1957_v31, %v3209_v53  ;;  %v1960_v38 = vsub.f32 1.0, %v2551_v32  ;;  %v1952_v52 = vmul.f32 %v2551_v32, %v3195_v48 }
 0x476   : > { %v2555_v39 = vpop.eup %2554  ;;  %2560 = vrcp.f32 %v1929_v33  ;;  %v1932_v40 = vadd.f32 1.0, %v2553_v34 }
 0x477   : > { %v2557_v6 = vpop.eup %2556  ;;  %v1982_v41 = vmax.f32 %v1974_v35, 0.0  ;;  %v1973_v11 = vadd.f32 %v1965_v37, %v1949_v36  ;;  %v1968_v42 = vmul.f32 %v3213_v54, %v1960_v38  ;;  %v1959_v43 = vsub.f32 1.0, %v2555_v39 }
 0x478   : > { %2562 = vrcp.f32 %v1932_v40  ;;  %v1931_v44 = vadd.f32 1.0, %v2557_v6  ;;  %v1951_v5 = vmul.f32 %v2555_v39, %v3197_v49 }
 0x479   : > { %1990 = vst.msk [vmem:[%s3271_s30 + $0x8] sm:$0xff] %vm1002_vm1, %v1982_v41  ;;  %v1981_v13 = vmax.f32 %v1973_v11, 0.0  ;;  %v1976_v53 = vadd.f32 %v1968_v42, %v1952_v52  ;;  %v1967_v10 = vmul.f32 %v1959_v43, %v3218_v55 }
 0x47a   : > { %2564 = vrcp.f32 %v1931_v44 }
 0x47b   : > { %1989 = vst.msk [vmem:[%s3271_s30] sm:$0xff] %vm1002_vm1, %v1981_v13  ;;  %v1984_v48 = vmax.f32 %v1976_v53, 0.0  ;;  %v1975_v54 = vadd.f32 %v1967_v10, %v1951_v5 }
 0x47d   : > { %1992 = vst.msk [vmem:[%s3271_s30 + $0x18] sm:$0xff] %vm1002_vm1, %v1984_v48  ;;  %v1983_v45 = vmax.f32 %v1975_v54, 0.0 }
 0x47f   : > { %1991 = vst.msk [vmem:[%s3271_s30 + $0x10] sm:$0xff] %vm1002_vm1, %v1983_v45 }
 0x481   : > { %v2559_v46 = vpop.eup %2558 }
 0x482   : > { %v1962_v8 = vsub.f32 1.0, %v2559_v46  ;;  %v1954_v1 = vmul.f32 %v2559_v46, %v3203_v50 }
 0x483   : > { %v2561_v14 = vpop.eup %2560 }
 0x484   : > { %v1970_v49 = vmul.f32 %v3223_v56, %v1962_v8  ;;  %v1961_v12 = vsub.f32 1.0, %v2561_v14  ;;  %v1953_v47 = vmul.f32 %v2561_v14, %v3205_v51 }
 0x485   : > { %v2563_v55 = vpop.eup %2562 }
 0x486   : > { %v1978_v16 = vadd.f32 %v1970_v49, %v1954_v1  ;;  %v1969_v0 = vmul.f32 %v1961_v12, %v3228_v57  ;;  %v1964_v3 = vsub.f32 1.0, %v2563_v55  ;;  %v1956_v62 = vmul.f32 %v2563_v55, %v3241_v60 }
 0x487   : > { %v2565_v4 = vpop.eup %2564 }
 0x488   : > { %v1986_v7 = vmax.f32 %v1978_v16, 0.0  ;;  %v1977_v9 = vadd.f32 %v1969_v0, %v1953_v47  ;;  %v1972_v50 = vmul.f32 %v3233_v58, %v1964_v3  ;;  %v1963_v56 = vsub.f32 1.0, %v2565_v4 }
 0x489   : > { %v1955_v51 = vmul.f32 %v2565_v4, %v3250_v61 }
 0x48a   : > { %1994 = vst.msk [vmem:[%s3271_s30 + $0x28] sm:$0xff] %vm1002_vm1, %v1986_v7  ;;  %v1985_v63 = vmax.f32 %v1977_v9, 0.0  ;;  %v1980_v17 = vadd.f32 %v1972_v50, %v1956_v62  ;;  %v1971_v57 = vmul.f32 %v1963_v56, %v3238_v59 }
 0x48c   : > { %1993 = vst.msk [vmem:[%s3271_s30 + $0x20] sm:$0xff] %vm1002_vm1, %v1985_v63  ;;  %v1988_v18 = vmax.f32 %v1980_v17, 0.0  ;;  %v1979_v60 = vadd.f32 %v1971_v57, %v1955_v51 }
 0x48e   : > { %1996 = vst.msk [vmem:[%s3271_s30 + $0x38] sm:$0xff] %vm1002_vm1, %v1988_v18  ;;  %v1987_v58 = vmax.f32 %v1979_v60, 0.0 }
 0x490   : > { %1995 = vst.msk [vmem:[%s3271_s30 + $0x30] sm:$0xff] %vm1002_vm1, %v1987_v58 }
 0x491   : > { %2635 = shalt.err (!%p2632_p4)
}
 0x492   : > { %s2636_s13 = scalar_lea.hbm %s3302_s24, 1024  ;;  %s2640_s15 = scalar_lea.hbm %s3360_s11, 2048 }
 0x493   : > { %p2637_p9 = scmp.ne.s32.totalorder %s3302_s24, %s2636_s13  ;;  %p2641_p5 = scmp.lt.s32.totalorder %s3302_s24, %s3360_s11 }
 0x494   : > { %p2642_p8 = scmp.lt.s32.totalorder %s2640_s15, %s2636_s13 }
 0x495   : > { %p2638_p11 = pnand %p2637_p9, %p3389_p1 }
 0x496   : > { %p2643_p6 = por %p2642_p8, %p2641_p5 }
 0x497   : > { %p2639_p3 = pneg %p2638_p11 }
 0x499   : > { %p2644_p13 = pnand %p2643_p6, %p2639_p3 }
 0x49b   : > { %2647 = shalt.err (!%p2644_p13)
}
 0x49c   : > { %s2697_s27 = smov 128   ;;  %s2698_s23 = smov 8  }
 0x49d   : > { %2483 = dma.vmem_to_hbm [thread:$0]  (%p3389_p1), %s3304_s12, 1024, %s3302_s24, %s1998_s21, %s2697_s27, %s2697_s27, %s2698_s23  }
 0x49e PF: > { %s3390_s25 = sld [smem:[#allocation11_spill]]  ;;  %p3393_p7 = scmp.ge.s32.totalorder %s2690_s20, 2 }
 0x49f   : > { %s3391_s26 = sld [smem:[#allocation15_spill]] }
 0x4a4   : > { %s2027_s17 = sand.u32 1, %s3390_s25  }
 0x4a5   : > { %p3392_p12 = scmp.ne.s32.totalorder %s3391_s26, 0  ;;  %s2028_s14 = scalar_lea.sflag [#allocation4], %s2027_s17 }
 0x4a7   : > { %p2493_p10 = pnand %p3393_p7, %p3392_p12 }
 0x4a9   : > { %p2494_p0 = pneg %p2493_p10 }
 0x4ab   : > { %2673 = dma.done.wait (%p2494_p0), %s2028_s14, 1024  }
 0x4ac   : > { %2675 = vsyncadd (%p2494_p0), %s2028_s14, 4294966272  ;;  %s3394_s20 = sld [smem:[#allocation13_spill]]  ;;  %s3397_s17 = smov %s2682_s18 }
 0x4ad   : > { %s3395_s28 = sld [smem:[#allocation12_spill]] }
 0x4ae   : > { %s3396_s19 = sld [smem:[#allocation14_spill]] }
 0x4b2   : > { %p27_p2 = scmp.ge.s32.totalorder %s3394_s20, 4  }
 0x4b3   : > { %s3398_s18 = smov %s3395_s28 }
 0x4b4   :  { %29 = sbr.rel (!%p27_p2) target bundleno = 9 (0x9), region = 122 }
 0x4b9   :  { %2033 = vsyncpa [#allocation3], 1 }
 0x4ba   :  { %2035 = vsyncpa [#allocation3 + $0x1], 1 }
 0x4bb   :  { %2036 = vsyncpa [#allocation6], 1 }
 0x4bc   :  { %2038 = vsyncpa [#allocation6 + $0x1], 1 }
 0x4bd   :  { %2039 = vsyncpa [#allocation4], 1 }
 0x4be   :  { %2041 = vsyncpa [#allocation4 + $0x1], 1 }

</bundles_post_ra>
